<compile_context>
chip_gen: v7x
topology: tpu7x:2x2x1
jax: 0.10.0
libtpu: 0.0.40
codegen_flags: <defaults>
</compile_context>

<pallas_src>
import functools

import numpy as np

import jax
import jax.numpy as jnp
from jax.experimental import pallas as pl
from jax.experimental.pallas import tpu as pltpu


def _reverse_rnn_kernel(tc, hoist_whh, bs_ref, xw_ref, h0_ref, whh_ref,
                        out_ref, hfin_ref, h_scratch):
    """One grid step = `tc` reverse time steps for one batch block.

    grid = (n_batch_blocks, n_time_chunks); time chunk index = program_id(1).

    bs_ref : SMEM (Tp,) int32        batch size per reversed step (0 for padding)
    xw_ref : VMEM (tc, Bb, Hp) bf16  precomputed x@W_ih^T + bias, reversed time
    h0_ref : VMEM (Bb, Hp) f32       initial hidden (reset source)
    whh_ref: VMEM (Hp, Hp) bf16      W_hh^T
    out_ref: VMEM (tc, Bb, Hp) bf16  per-step hidden (reversed time)
    hfin   : VMEM (Bb, Hp) f32       final hidden (written on last chunk only)
    """
    c = pl.program_id(1)

    # On the first (reverse) chunk of this batch block the carried hidden
    # starts from h0; rows not yet active simply keep their h0 value, which
    # reproduces the ReverseResetPoint concat-from-initial semantics.
    @pl.when(c == 0)
    def _():
        h_scratch[...] = h0_ref[...]

    # Small weights: hoist once per chunk into vregs. Large weights: let
    # Mosaic stream the MXU RHS from VMEM (avoids vreg spills in the unrolled
    # loop).
    whh = whh_ref[...] if hoist_whh else None
    row = jax.lax.broadcasted_iota(jnp.int32, h_scratch.shape, 0)  # hoisted

    def step(j, h):
        bs = bs_ref[c * tc + j]                                    # SMEM scalar
        w = whh if hoist_whh else whh_ref[...]
        pre = jnp.dot(h.astype(jnp.bfloat16), w,
                      preferred_element_type=jnp.float32)
        pre = pre + xw_ref[j].astype(jnp.float32)                  # fp32 accumulate
        h_new = jnp.tanh(pre)                                      # fp32 EUP
        h_upd = jnp.where(row < bs, h_new, h)                      # inactive rows keep h
        out_ref[j] = h_upd.astype(out_ref.dtype)                   # bf16 stream
        return h_upd

    h_last = jax.lax.fori_loop(0, tc, step, h_scratch[...], unroll=True)
    h_scratch[...] = h_last

    @pl.when(c == pl.num_programs(1) - 1)
    def _():
        hfin_ref[...] = h_last


def variable_recurrent_reverse(packed_input, hidden0, batch_sizes,
                               w_ih, w_hh, b_ih, b_hh, *, time_chunk=64):
    """Pallas implementation of VariableRecurrentReverse.forward (flat hidden).

    packed_input: (sum(batch_sizes), I)   (PackedSequence.data layout)
    hidden0     : (B, H), B == batch_sizes[0]
    batch_sizes : python list/tuple of non-increasing ints
    w_ih        : (H, I), w_hh: (H, H), b_ih/b_hh: (H,)
    Returns (final_hidden (B, H), packed_output (sum(batch_sizes), H)).
    """
    batch_sizes = [int(b) for b in batch_sizes]
    T = len(batch_sizes)
    B = batch_sizes[0]
    H = hidden0.shape[1]
    I = packed_input.shape[1]
    out_dtype = packed_input.dtype
    hid_dtype = hidden0.dtype
    f32 = jnp.float32
    bf16 = jnp.bfloat16

    # Lane-dense padded hidden width: 128 when H <= 128, otherwise a multiple
    # of 256 so both the contraction and the N dim fill the 256-wide MXU.
    if H <= 128:
        Hp = 128
    else:
        Hp = ((H + 255) // 256) * 256
    # bf16 vregs pack 16 sublanes: pad batch to a multiple of 16.
    Bp = ((B + 15) // 16) * 16

    # Batch rows are independent in this recurrence: tile them into blocks so
    # a leading "parallel" grid axis can shard them across TensorCores
    # (v7x has 2 TCs/chip; degenerates to one block at small B).
    if Bp > 128 and Bp % 128 == 0:
        Bb = 128
    else:
        Bb = Bp
    n_bblocks = Bp // Bb

    # VMEM-aware time chunk: double-buffered bf16 xw/out streams + weights +
    # scratch must fit the per-chip VMEM budget (64 MiB on v7x, 128 on v5e/v6e).
    try:
        vmem_phys = int(pltpu.get_tpu_info().vmem_capacity_bytes)
    except Exception:
        vmem_phys = 64 * 1024 * 1024              # v7x-conservative fallback
    vmem_budget = (vmem_phys * 3) // 5            # leave compiler headroom
    fixed_bytes = (2 * Hp * Hp * 2                # W_hh^T bf16 (double-buffered)
                   + 2 * Bb * Hp * 4              # h0 (double-buffered)
                   + Bb * Hp * 4                  # carried-hidden scratch
                   + 2 * Bb * Hp * 4)             # final-hidden output
    per_tc_bytes = 2 * (Bb * Hp * 2) * 2          # xw in + out, bf16, double-buffered
    tc_cap = max(1, (vmem_budget - fixed_bytes) // per_tc_bytes)
    tc = max(1, min(int(time_chunk), T, int(tc_cap)))
    n_chunks = -(-T // tc)
    tc = -(-T // n_chunks)                        # rebalance: minimal bs==0 padding
    Tp = n_chunks * tc

    offsets = np.concatenate([[0], np.cumsum(batch_sizes)]).astype(np.int64)
    total = int(offsets[-1])

    # ---- glue: one gather of the *raw* packed input (width I) into the
    # reversed-time padded layout (Tp, Bp, I). Padded slots point at row 0
    # (finite data); the in-kernel row<bs select discards them, so no
    # wrapper-side masking pass is needed.
    gidx = np.zeros((Tp, Bp), np.int32)
    for s in range(T):
        rt = T - 1 - s
        bs = batch_sizes[rt]
        gidx[s, :bs] = offsets[rt] + np.arange(bs)
    x_rev = packed_input.astype(f32)[jnp.asarray(gidx)]            # (Tp, Bp, I)

    # ---- Phase 1 (plain XLA): input projection hoisted out of the
    # recurrence, written directly into the lane-dense reversed buffer (bf16).
    wih_t_pad = jnp.zeros((I, Hp), f32).at[:, :H].set(jnp.asarray(w_ih, f32).T)
    bias_pad = jnp.zeros((Hp,), f32).at[:H].set(
        jnp.asarray(b_ih, f32) + jnp.asarray(b_hh, f32))
    xw_rev = (jnp.dot(x_rev.reshape(Tp * Bp, I), wih_t_pad,
                      preferred_element_type=f32) + bias_pad)
    xw_rev = xw_rev.astype(bf16).reshape(Tp, Bp, Hp)

    h0_pad = jnp.zeros((Bp, Hp), f32).at[:B, :H].set(hidden0.astype(f32))
    whh_pad = jnp.zeros((Hp, Hp), bf16).at[:H, :H].set(
        jnp.asarray(w_hh, f32).T.astype(bf16))                     # bf16 weights

    bs_rev = np.zeros((Tp,), np.int32)
    bs_rev[:T] = np.asarray(batch_sizes[::-1], np.int32)           # 0 for padded steps
    bs_rev = jnp.asarray(bs_rev)

    hoist_whh = Hp < 512

    grid_spec = pltpu.PrefetchScalarGridSpec(
        num_scalar_prefetch=1,
        grid=(n_bblocks, n_chunks),
        in_specs=[
            pl.BlockSpec((tc, Bb, Hp), lambda b, c, bs: (c, b, 0)),  # xw chunk (rev)
            pl.BlockSpec((Bb, Hp), lambda b, c, bs: (b, 0)),         # h0
            pl.BlockSpec((Hp, Hp), lambda b, c, bs: (0, 0)),         # W_hh^T bf16
        ],
        out_specs=[
            pl.BlockSpec((tc, Bb, Hp), lambda b, c, bs: (c, b, 0)),  # per-step hidden
            pl.BlockSpec((Bb, Hp), lambda b, c, bs: (b, 0)),         # final hidden
        ],
        scratch_shapes=[pltpu.VMEM((Bb, Hp), f32)],                  # carried hidden
    )

    out_rev, hfin = pl.pallas_call(
        functools.partial(_reverse_rnn_kernel, tc, hoist_whh),
        out_shape=(jax.ShapeDtypeStruct((Tp, Bp, Hp), bf16),
                   jax.ShapeDtypeStruct((Bp, Hp), f32)),
        grid_spec=grid_spec,
        compiler_params=pltpu.CompilerParams(
            # batch blocks are independent (parallel); the time recurrence is
            # sequential (arbitrary).
            dimension_semantics=("parallel", "arbitrary"),
            vmem_limit_bytes=int(max(vmem_budget, 32 * 1024 * 1024))),
    )(bs_rev, xw_rev, h0_pad, whh_pad)

    # ---- glue: one gather reversed-padded output -> PackedSequence layout.
    s_idx = np.zeros((total,), np.int32)
    b_idx = np.zeros((total,), np.int32)
    for t, bs in enumerate(batch_sizes):
        s_idx[offsets[t]:offsets[t] + bs] = T - 1 - t
        b_idx[offsets[t]:offsets[t] + bs] = np.arange(bs)
    packed_output = out_rev[jnp.asarray(s_idx), jnp.asarray(b_idx), :H].astype(out_dtype)
    h_final = hfin[:B, :H].astype(hid_dtype)
    return h_final, packed_output


def reference_forward(packed_input, hidden0, batch_sizes, w_ih, w_hh, b_ih, b_hh):
    """Pure-JAX mirror of the PyTorch VariableRecurrentReverse loop (fp32)."""
    wih_t, whh_t = w_ih.T, w_hh.T
    bias = b_ih + b_hh
    output = []
    input_offset = packed_input.shape[0]
    last_bs = batch_sizes[-1]
    hidden = hidden0[:last_bs]
    for bs in reversed(batch_sizes):
        inc = bs - last_bs
        if inc > 0:
            hidden = jnp.concatenate([hidden, hidden0[last_bs:bs]], axis=0)
        last_bs = bs
        step = packed_input[input_offset - bs:input_offset]
        input_offset -= bs
        hidden = jnp.tanh(step @ wih_t + hidden @ whh_t + bias)
        output.append(hidden)
    output.reverse()
    return hidden, jnp.concatenate(output, axis=0)


if __name__ == "__main__":
    key = jax.random.PRNGKey(0)
    B, I, H = 8, 16, 32
    batch_sizes = [8, 7, 5, 5, 3, 2]          # non-increasing, B == batch_sizes[0]
    total = sum(batch_sizes)

    k1, k2, k3, k4, k5, k6 = jax.random.split(key, 6)
    bound = 1.0 / (H ** 0.5)
    packed_input = jax.random.normal(k1, (total, I), jnp.float32)
    hidden0 = jax.random.normal(k2, (B, H), jnp.float32)
    w_ih = jax.random.uniform(k3, (H, I), jnp.float32, -bound, bound)
    w_hh = jax.random.uniform(k4, (H, H), jnp.float32, -bound, bound)
    b_ih = jax.random.uniform(k5, (H,), jnp.float32, -bound, bound)
    b_hh = jax.random.uniform(k6, (H,), jnp.float32, -bound, bound)

    h_final, out_packed = variable_recurrent_reverse(
        packed_input, hidden0, batch_sizes, w_ih, w_hh, b_ih, b_hh)
    jax.block_until_ready((h_final, out_packed))

    h_ref, out_ref = reference_forward(
        packed_input, hidden0, batch_sizes, w_ih, w_hh, b_ih, b_hh)
    assert h_final.shape == (B, H) and out_packed.shape == (total, H)
    # Precision policy (documented): W_hh^T, the per-step hidden cast at the
    # recurrent dot, the precomputed xw stream and the per-step output stream
    # are bf16; the carried hidden, accumulation and tanh are fp32. Tolerance
    # vs. the fp32 reference reflects that.
    assert jnp.allclose(h_final, h_ref, atol=3e-2, rtol=3e-2)
    assert jnp.allclose(out_packed, out_ref, atol=3e-2, rtol=3e-2)

    print("KERNEL_OK")
</pallas_src>

<mosaic_0001>
module attributes {stable_mosaic.version = 11 : i64} {
  func.func @_reverse_rnn_kernel(%arg0: i32, %arg1: i32, %arg2: memref<6xi32, #tpu.memory_space<smem>>, %arg3: memref<6x16x128xbf16, #tpu.memory_space<vmem>>, %arg4: memref<16x128xf32, #tpu.memory_space<vmem>>, %arg5: memref<128x128xbf16, #tpu.memory_space<vmem>>, %arg6: memref<6x16x128xbf16, #tpu.memory_space<vmem>>, %arg7: memref<16x128xf32, #tpu.memory_space<vmem>>, %arg8: memref<16x128xf32, #tpu.memory_space<vmem>>) attributes {dimension_semantics = [#tpu.dimension_semantics<parallel>, #tpu.dimension_semantics<arbitrary>], iteration_bounds = array<i64: 1, 1>, scalar_prefetch = 1 : i64, scratch_operands = 1 : i64, tpu.core_type = #tpu.core_type<tc>, window_params = [{transform_indices = @transform_0, window_bounds = array<i64: 6, 16, 128>}, {transform_indices = @transform_1, window_bounds = array<i64: 16, 128>}, {pipeline_mode = #tpu.pipeline_mode<synchronous>, transform_indices = @transform_2, window_bounds = array<i64: 128, 128>}, {transform_indices = @transform_3, window_bounds = array<i64: 6, 16, 128>}, {transform_indices = @transform_4, window_bounds = array<i64: 16, 128>}]} {
    %c0_i32 = arith.constant 0 : i32
    %0 = arith.cmpi eq, %arg1, %c0_i32 : i32
    %1 = arith.extui %0 : i1 to i32
    %c0_i32_0 = arith.constant 0 : i32
    %2 = arith.cmpi ne, %1, %c0_i32_0 : i32
    scf.if %2 {
      %c0_44 = arith.constant 0 : index
      %c0_45 = arith.constant 0 : index
      %130 = vector.load %arg4[%c0_44, %c0_45] : memref<16x128xf32, #tpu.memory_space<vmem>>, vector<16x128xf32>
      %c0_46 = arith.constant 0 : index
      %c0_47 = arith.constant 0 : index
      %131 = vector.load %arg8[%c0_46, %c0_47] : memref<16x128xf32, #tpu.memory_space<vmem>>, vector<16x128xf32>
      tpu.vector_store %arg8[%c0_46, %c0_47], %130 {strides = array<i32>} : memref<16x128xf32, #tpu.memory_space<vmem>>, vector<16x128xf32>,
    } else {
    }
    %c0 = arith.constant 0 : index
    %c0_1 = arith.constant 0 : index
    %3 = vector.load %arg5[%c0, %c0_1] : memref<128x128xbf16, #tpu.memory_space<vmem>>, vector<128x128xbf16>
    %4 = tpu.iota {dimensions = array<i32: 0>} : vector<16x128xi32>
    %c0_2 = arith.constant 0 : index
    %c0_3 = arith.constant 0 : index
    %5 = vector.load %arg8[%c0_2, %c0_3] : memref<16x128xf32, #tpu.memory_space<vmem>>, vector<16x128xf32>
    %c0_i32_4 = arith.constant 0 : i32
    %c6_i32 = arith.constant 6 : i32
    %6 = arith.muli %arg1, %c6_i32 : i32
    %7 = arith.addi %6, %c0_i32_4 : i32
    %8 = arith.index_cast %7 : i32 to index
    %9 = memref.load %arg2[%8] : memref<6xi32, #tpu.memory_space<smem>>
    %10 = arith.truncf %5 : vector<16x128xf32> to vector<16x128xbf16>
    %cst = arith.constant dense<0.000000e+00> : vector<16x128xf32>
    %11 = tpu.matmul %10, %3, %cst {dimension_numbers = #tpu.dot_dimension_numbers<[1], [0], [0], [1], [0, 0, 1, 1], [], []>} : vector<16x128xbf16>, vector<128x128xbf16>, vector<16x128xf32> -> vector<16x128xf32>
    %12 = arith.index_cast %c0_i32_4 : i32 to index
    %c0_5 = arith.constant 0 : index
    %c0_6 = arith.constant 0 : index
    %13 = vector.load %arg3[%12, %c0_5, %c0_6] : memref<6x16x128xbf16, #tpu.memory_space<vmem>>, vector<1x16x128xbf16>
    %14 = vector.shape_cast %13 : vector<1x16x128xbf16> to vector<16x128xbf16>
    %15 = arith.extf %14 : vector<16x128xbf16> to vector<16x128xf32>
    %16 = arith.addf %11, %15 : vector<16x128xf32>
    %17 = math.tanh %16 : vector<16x128xf32>
    %18 = vector.broadcast %9 : i32 to vector<16x128xi32>
    %19 = arith.cmpi slt, %4, %18 : vector<16x128xi32>
    %20 = arith.select %19, %17, %5 : vector<16x128xi1>, vector<16x128xf32>
    %21 = arith.truncf %20 : vector<16x128xf32> to vector<16x128xbf16>
    %22 = arith.index_cast %c0_i32_4 : i32 to index
    %c0_7 = arith.constant 0 : index
    %c0_8 = arith.constant 0 : index
    %23 = vector.load %arg6[%22, %c0_7, %c0_8] : memref<6x16x128xbf16, #tpu.memory_space<vmem>>, vector<1x16x128xbf16>
    %24 = vector.shape_cast %23 : vector<1x16x128xbf16> to vector<16x128xbf16>
    %25 = vector.shape_cast %21 : vector<16x128xbf16> to vector<1x16x128xbf16>
    tpu.vector_store %arg6[%22, %c0_7, %c0_8], %25 {strides = array<i32>} : memref<6x16x128xbf16, #tpu.memory_space<vmem>>, vector<1x16x128xbf16>,
    %c1_i32 = arith.constant 1 : i32
    %c6_i32_9 = arith.constant 6 : i32
    %26 = arith.muli %arg1, %c6_i32_9 : i32
    %27 = arith.addi %26, %c1_i32 : i32
    %28 = arith.index_cast %27 : i32 to index
    %29 = memref.load %arg2[%28] : memref<6xi32, #tpu.memory_space<smem>>
    %30 = arith.truncf %20 : vector<16x128xf32> to vector<16x128xbf16>
    %cst_10 = arith.constant dense<0.000000e+00> : vector<16x128xf32>
    %31 = tpu.matmul %30, %3, %cst_10 {dimension_numbers = #tpu.dot_dimension_numbers<[1], [0], [0], [1], [0, 0, 1, 1], [], []>} : vector<16x128xbf16>, vector<128x128xbf16>, vector<16x128xf32> -> vector<16x128xf32>
    %32 = arith.index_cast %c1_i32 : i32 to index
    %c0_11 = arith.constant 0 : index
    %c0_12 = arith.constant 0 : index
    %33 = vector.load %arg3[%32, %c0_11, %c0_12] : memref<6x16x128xbf16, #tpu.memory_space<vmem>>, vector<1x16x128xbf16>
    %34 = vector.shape_cast %33 : vector<1x16x128xbf16> to vector<16x128xbf16>
    %35 = arith.extf %34 : vector<16x128xbf16> to vector<16x128xf32>
    %36 = arith.addf %31, %35 : vector<16x128xf32>
    %37 = math.tanh %36 : vector<16x128xf32>
    %38 = vector.broadcast %29 : i32 to vector<16x128xi32>
    %39 = arith.cmpi slt, %4, %38 : vector<16x128xi32>
    %40 = arith.select %39, %37, %20 : vector<16x128xi1>, vector<16x128xf32>
    %41 = arith.truncf %40 : vector<16x128xf32> to vector<16x128xbf16>
    %42 = arith.index_cast %c1_i32 : i32 to index
    %c0_13 = arith.constant 0 : index
    %c0_14 = arith.constant 0 : index
    %43 = vector.load %arg6[%42, %c0_13, %c0_14] : memref<6x16x128xbf16, #tpu.memory_space<vmem>>, vector<1x16x128xbf16>
    %44 = vector.shape_cast %43 : vector<1x16x128xbf16> to vector<16x128xbf16>
    %45 = vector.shape_cast %41 : vector<16x128xbf16> to vector<1x16x128xbf16>
    tpu.vector_store %arg6[%42, %c0_13, %c0_14], %45 {strides = array<i32>} : memref<6x16x128xbf16, #tpu.memory_space<vmem>>, vector<1x16x128xbf16>,
    %c2_i32 = arith.constant 2 : i32
    %c6_i32_15 = arith.constant 6 : i32
    %46 = arith.muli %arg1, %c6_i32_15 : i32
    %47 = arith.addi %46, %c2_i32 : i32
    %48 = arith.index_cast %47 : i32 to index
    %49 = memref.load %arg2[%48] : memref<6xi32, #tpu.memory_space<smem>>
    %50 = arith.truncf %40 : vector<16x128xf32> to vector<16x128xbf16>
    %cst_16 = arith.constant dense<0.000000e+00> : vector<16x128xf32>
    %51 = tpu.matmul %50, %3, %cst_16 {dimension_numbers = #tpu.dot_dimension_numbers<[1], [0], [0], [1], [0, 0, 1, 1], [], []>} : vector<16x128xbf16>, vector<128x128xbf16>, vector<16x128xf32> -> vector<16x128xf32>
    %52 = arith.index_cast %c2_i32 : i32 to index
    %c0_17 = arith.constant 0 : index
    %c0_18 = arith.constant 0 : index
    %53 = vector.load %arg3[%52, %c0_17, %c0_18] : memref<6x16x128xbf16, #tpu.memory_space<vmem>>, vector<1x16x128xbf16>
    %54 = vector.shape_cast %53 : vector<1x16x128xbf16> to vector<16x128xbf16>
    %55 = arith.extf %54 : vector<16x128xbf16> to vector<16x128xf32>
    %56 = arith.addf %51, %55 : vector<16x128xf32>
    %57 = math.tanh %56 : vector<16x128xf32>
    %58 = vector.broadcast %49 : i32 to vector<16x128xi32>
    %59 = arith.cmpi slt, %4, %58 : vector<16x128xi32>
    %60 = arith.select %59, %57, %40 : vector<16x128xi1>, vector<16x128xf32>
    %61 = arith.truncf %60 : vector<16x128xf32> to vector<16x128xbf16>
    %62 = arith.index_cast %c2_i32 : i32 to index
    %c0_19 = arith.constant 0 : index
    %c0_20 = arith.constant 0 : index
    %63 = vector.load %arg6[%62, %c0_19, %c0_20] : memref<6x16x128xbf16, #tpu.memory_space<vmem>>, vector<1x16x128xbf16>
    %64 = vector.shape_cast %63 : vector<1x16x128xbf16> to vector<16x128xbf16>
    %65 = vector.shape_cast %61 : vector<16x128xbf16> to vector<1x16x128xbf16>
    tpu.vector_store %arg6[%62, %c0_19, %c0_20], %65 {strides = array<i32>} : memref<6x16x128xbf16, #tpu.memory_space<vmem>>, vector<1x16x128xbf16>,
    %c3_i32 = arith.constant 3 : i32
    %c6_i32_21 = arith.constant 6 : i32
    %66 = arith.muli %arg1, %c6_i32_21 : i32
    %67 = arith.addi %66, %c3_i32 : i32
    %68 = arith.index_cast %67 : i32 to index
    %69 = memref.load %arg2[%68] : memref<6xi32, #tpu.memory_space<smem>>
    %70 = arith.truncf %60 : vector<16x128xf32> to vector<16x128xbf16>
    %cst_22 = arith.constant dense<0.000000e+00> : vector<16x128xf32>
    %71 = tpu.matmul %70, %3, %cst_22 {dimension_numbers = #tpu.dot_dimension_numbers<[1], [0], [0], [1], [0, 0, 1, 1], [], []>} : vector<16x128xbf16>, vector<128x128xbf16>, vector<16x128xf32> -> vector<16x128xf32>
    %72 = arith.index_cast %c3_i32 : i32 to index
    %c0_23 = arith.constant 0 : index
    %c0_24 = arith.constant 0 : index
    %73 = vector.load %arg3[%72, %c0_23, %c0_24] : memref<6x16x128xbf16, #tpu.memory_space<vmem>>, vector<1x16x128xbf16>
    %74 = vector.shape_cast %73 : vector<1x16x128xbf16> to vector<16x128xbf16>
    %75 = arith.extf %74 : vector<16x128xbf16> to vector<16x128xf32>
    %76 = arith.addf %71, %75 : vector<16x128xf32>
    %77 = math.tanh %76 : vector<16x128xf32>
    %78 = vector.broadcast %69 : i32 to vector<16x128xi32>
    %79 = arith.cmpi slt, %4, %78 : vector<16x128xi32>
    %80 = arith.select %79, %77, %60 : vector<16x128xi1>, vector<16x128xf32>
    %81 = arith.truncf %80 : vector<16x128xf32> to vector<16x128xbf16>
    %82 = arith.index_cast %c3_i32 : i32 to index
    %c0_25 = arith.constant 0 : index
    %c0_26 = arith.constant 0 : index
    %83 = vector.load %arg6[%82, %c0_25, %c0_26] : memref<6x16x128xbf16, #tpu.memory_space<vmem>>, vector<1x16x128xbf16>
    %84 = vector.shape_cast %83 : vector<1x16x128xbf16> to vector<16x128xbf16>
    %85 = vector.shape_cast %81 : vector<16x128xbf16> to vector<1x16x128xbf16>
    tpu.vector_store %arg6[%82, %c0_25, %c0_26], %85 {strides = array<i32>} : memref<6x16x128xbf16, #tpu.memory_space<vmem>>, vector<1x16x128xbf16>,
    %c4_i32 = arith.constant 4 : i32
    %c6_i32_27 = arith.constant 6 : i32
    %86 = arith.muli %arg1, %c6_i32_27 : i32
    %87 = arith.addi %86, %c4_i32 : i32
    %88 = arith.index_cast %87 : i32 to index
    %89 = memref.load %arg2[%88] : memref<6xi32, #tpu.memory_space<smem>>
    %90 = arith.truncf %80 : vector<16x128xf32> to vector<16x128xbf16>
    %cst_28 = arith.constant dense<0.000000e+00> : vector<16x128xf32>
    %91 = tpu.matmul %90, %3, %cst_28 {dimension_numbers = #tpu.dot_dimension_numbers<[1], [0], [0], [1], [0, 0, 1, 1], [], []>} : vector<16x128xbf16>, vector<128x128xbf16>, vector<16x128xf32> -> vector<16x128xf32>
    %92 = arith.index_cast %c4_i32 : i32 to index
    %c0_29 = arith.constant 0 : index
    %c0_30 = arith.constant 0 : index
    %93 = vector.load %arg3[%92, %c0_29, %c0_30] : memref<6x16x128xbf16, #tpu.memory_space<vmem>>, vector<1x16x128xbf16>
    %94 = vector.shape_cast %93 : vector<1x16x128xbf16> to vector<16x128xbf16>
    %95 = arith.extf %94 : vector<16x128xbf16> to vector<16x128xf32>
    %96 = arith.addf %91, %95 : vector<16x128xf32>
    %97 = math.tanh %96 : vector<16x128xf32>
    %98 = vector.broadcast %89 : i32 to vector<16x128xi32>
    %99 = arith.cmpi slt, %4, %98 : vector<16x128xi32>
    %100 = arith.select %99, %97, %80 : vector<16x128xi1>, vector<16x128xf32>
    %101 = arith.truncf %100 : vector<16x128xf32> to vector<16x128xbf16>
    %102 = arith.index_cast %c4_i32 : i32 to index
    %c0_31 = arith.constant 0 : index
    %c0_32 = arith.constant 0 : index
    %103 = vector.load %arg6[%102, %c0_31, %c0_32] : memref<6x16x128xbf16, #tpu.memory_space<vmem>>, vector<1x16x128xbf16>
    %104 = vector.shape_cast %103 : vector<1x16x128xbf16> to vector<16x128xbf16>
    %105 = vector.shape_cast %101 : vector<16x128xbf16> to vector<1x16x128xbf16>
    tpu.vector_store %arg6[%102, %c0_31, %c0_32], %105 {strides = array<i32>} : memref<6x16x128xbf16, #tpu.memory_space<vmem>>, vector<1x16x128xbf16>,
    %c5_i32 = arith.constant 5 : i32
    %c6_i32_33 = arith.constant 6 : i32
    %106 = arith.muli %arg1, %c6_i32_33 : i32
    %107 = arith.addi %106, %c5_i32 : i32
    %108 = arith.index_cast %107 : i32 to index
    %109 = memref.load %arg2[%108] : memref<6xi32, #tpu.memory_space<smem>>
    %110 = arith.truncf %100 : vector<16x128xf32> to vector<16x128xbf16>
    %cst_34 = arith.constant dense<0.000000e+00> : vector<16x128xf32>
    %111 = tpu.matmul %110, %3, %cst_34 {dimension_numbers = #tpu.dot_dimension_numbers<[1], [0], [0], [1], [0, 0, 1, 1], [], []>} : vector<16x128xbf16>, vector<128x128xbf16>, vector<16x128xf32> -> vector<16x128xf32>
    %112 = arith.index_cast %c5_i32 : i32 to index
    %c0_35 = arith.constant 0 : index
    %c0_36 = arith.constant 0 : index
    %113 = vector.load %arg3[%112, %c0_35, %c0_36] : memref<6x16x128xbf16, #tpu.memory_space<vmem>>, vector<1x16x128xbf16>
    %114 = vector.shape_cast %113 : vector<1x16x128xbf16> to vector<16x128xbf16>
    %115 = arith.extf %114 : vector<16x128xbf16> to vector<16x128xf32>
    %116 = arith.addf %111, %115 : vector<16x128xf32>
    %117 = math.tanh %116 : vector<16x128xf32>
    %118 = vector.broadcast %109 : i32 to vector<16x128xi32>
    %119 = arith.cmpi slt, %4, %118 : vector<16x128xi32>
    %120 = arith.select %119, %117, %100 : vector<16x128xi1>, vector<16x128xf32>
    %121 = arith.truncf %120 : vector<16x128xf32> to vector<16x128xbf16>
    %122 = arith.index_cast %c5_i32 : i32 to index
    %c0_37 = arith.constant 0 : index
    %c0_38 = arith.constant 0 : index
    %123 = vector.load %arg6[%122, %c0_37, %c0_38] : memref<6x16x128xbf16, #tpu.memory_space<vmem>>, vector<1x16x128xbf16>
    %124 = vector.shape_cast %123 : vector<1x16x128xbf16> to vector<16x128xbf16>
    %125 = vector.shape_cast %121 : vector<16x128xbf16> to vector<1x16x128xbf16>
    tpu.vector_store %arg6[%122, %c0_37, %c0_38], %125 {strides = array<i32>} : memref<6x16x128xbf16, #tpu.memory_space<vmem>>, vector<1x16x128xbf16>,
    %c6_i32_39 = arith.constant 6 : i32
    %c0_40 = arith.constant 0 : index
    %c0_41 = arith.constant 0 : index
    %126 = vector.load %arg8[%c0_40, %c0_41] : memref<16x128xf32, #tpu.memory_space<vmem>>, vector<16x128xf32>
    tpu.vector_store %arg8[%c0_40, %c0_41], %120 {strides = array<i32>} : memref<16x128xf32, #tpu.memory_space<vmem>>, vector<16x128xf32>,
    %c0_i32_42 = arith.constant 0 : i32
    %127 = arith.cmpi eq, %arg1, %c0_i32_42 : i32
    %128 = arith.extui %127 : i1 to i32
    %c0_i32_43 = arith.constant 0 : i32
    %129 = arith.cmpi ne, %128, %c0_i32_43 : i32
    scf.if %129 {
      %c0_44 = arith.constant 0 : index
      %c0_45 = arith.constant 0 : index
      %130 = vector.load %arg7[%c0_44, %c0_45] : memref<16x128xf32, #tpu.memory_space<vmem>>, vector<16x128xf32>
      tpu.vector_store %arg7[%c0_44, %c0_45], %120 {strides = array<i32>} : memref<16x128xf32, #tpu.memory_space<vmem>>, vector<16x128xf32>,
    } else {
    }
    return
  }
  func.func @transform_0(%arg0: i32, %arg1: i32, %arg2: memref<6xi32, #tpu.memory_space<smem>>) -> (i32, i32, i32) {
    %c0_i32 = arith.constant 0 : i32
    %c0_i32_0 = arith.constant 0 : i32
    return %arg1, %arg0, %c0_i32 : i32, i32, i32
  }
  func.func @transform_1(%arg0: i32, %arg1: i32, %arg2: memref<6xi32, #tpu.memory_space<smem>>) -> (i32, i32) {
    %c0_i32 = arith.constant 0 : i32
    %c0_i32_0 = arith.constant 0 : i32
    return %arg0, %c0_i32 : i32, i32
  }
  func.func @transform_2(%arg0: i32, %arg1: i32, %arg2: memref<6xi32, #tpu.memory_space<smem>>) -> (i32, i32) {
    %c0_i32 = arith.constant 0 : i32
    %c0_i32_0 = arith.constant 0 : i32
    %c0_i32_1 = arith.constant 0 : i32
    return %c0_i32, %c0_i32_0 : i32, i32
  }
  func.func @transform_3(%arg0: i32, %arg1: i32, %arg2: memref<6xi32, #tpu.memory_space<smem>>) -> (i32, i32, i32) {
    %c0_i32 = arith.constant 0 : i32
    %c0_i32_0 = arith.constant 0 : i32
    return %arg1, %arg0, %c0_i32 : i32, i32, i32
  }
  func.func @transform_4(%arg0: i32, %arg1: i32, %arg2: memref<6xi32, #tpu.memory_space<smem>>) -> (i32, i32) {
    %c0_i32 = arith.constant 0 : i32
    %c0_i32_0 = arith.constant 0 : i32
    return %arg0, %c0_i32 : i32, i32
  }
}

</mosaic_0001>

<bundles_post_ra>
// kernel: tpu_custom_call.1
= control target key start
LH: loop header
LB: loop body
LE: loop exit
PB: predicated region body
PF: predicated region fallthrough
CT: control target
= control target key end

     0   :  { %s1294_s0 = inlined_call_operand.hbm [shape: s32[6], index: 0, kind: input, shape index: {}]   ;;  %s1295_s1 = inlined_call_operand.hbm [shape: bf16[6,16,128], index: 1, kind: input, shape index: {}]   ;;  %s1296_s2 = inlined_call_operand.hbm [shape: f32[16,128], index: 2, kind: input, shape index: {}]   ;;  %s1297_s3 = inlined_call_operand.hbm [shape: bf16[128,128], index: 3, kind: input, shape index: {}]   ;;  %s1298_s4 = inlined_call_operand.hbm [shape: bf16[6,16,128], index: 4, kind: output, shape index: {0}]   ;;  %s1299_s5 = inlined_call_operand.hbm [shape: f32[16,128], index: 5, kind: output, shape index: {1}]  }
   0x1   :  { %s887_s20 = scalar_lea.hbm %s1294_s0, 16 }
   0x2   :  { %p888_p0 = scmp.ne.s32.totalorder %s1294_s0, %s887_s20  ;;  %p891_p1 = scmp.lt.u32.totalorder %s887_s20, %s1294_s0 }
   0x4   :  { %p893_p2 = pnand %p891_p1, %p888_p0 }
   0x6   :  { %896 = shalt.err (!%p893_p2)  }
   0x7   :  { %s1017_s25 = smov [#allocation4]  }
   0x8   :  { %12 = dma.hbm_to_smem %s1294_s0, 16, %s1017_s25, [#allocation3] }
   0x9   :  { %1007 = dma.done.wait [#allocation3], 16 }
   0xa   :  { %1008 = vsyncadd [#allocation3], 4294967280 }
   0xb   :  { %14 = sfence }
   0xc   :  { %15 = vsyncpa [#allocation6], 0 }
   0xd   :  { %16 = vsyncpa [#allocation9], 0 }
   0xe   :  { %17 = vsyncpa [#allocation7], 0 }
   0xf   :  { %18 = vsyncpa [#allocation13], 0  ;;  %s1018_s28 = smov [#allocation8]   ;;  %s897_s7 = scalar_lea.hbm %s1296_s2, 256 }
  0x10   :  { %s36_s29 = sshll.u32 %s1018_s28, 4  ;;  %p898_p3 = scmp.ne.s32.totalorder %s1296_s2, %s897_s7  ;;  %s37_s29 = int_to_ptr.vmem [resolvable:$true] %s36_s29 }
  0x11   :  { %p901_p4 = scmp.lt.u32.totalorder %s897_s7, %s1296_s2 }
  0x13   :  { %p903_p5 = pnand %p901_p4, %p898_p3 }
  0x15   :  { %906 = shalt.err (!%p903_p5)
}
  0x16   :  { %s907_s11 = scalar_lea.vmem %s37_s29, 256  ;;  %p912_p7 = scmp.lt.s32.totalorder %s37_s29, %s37_s29 }
  0x17   :  { %p908_p6 = scmp.ne.s32.totalorder %s37_s29, %s907_s11  ;;  %p913_p8 = scmp.lt.s32.totalorder %s907_s11, %s907_s11 }
  0x19   :  { %p914_p9 = por %p913_p8, %p912_p7 }
  0x1b   :  { %p915_p10 = pnand %p914_p9, %p908_p6 }
  0x1d   :  { %918 = shalt.err (!%p915_p10)
}
  0x1e   :  { %s1019_s12 = smov 128   ;;  %s1020_s13 = smov 8  }
  0x1f   :  { %42 = dma.hbm_to_vmem [thread:$0]  %s1296_s2, 256, %s37_s29, [#allocation9], %s1019_s12, %s1019_s12, %s1020_s13  }
  0x20   :  { %s1021_s16 = smov [#allocation5]   ;;  %s919_s20 = scalar_lea.hbm %s1295_s1, 768 }
  0x21   :  { %s24_s17 = sshll.u32 %s1021_s16, 4  ;;  %p920_p11 = scmp.ne.s32.totalorder %s1295_s1, %s919_s20  ;;  %s25_s17 = int_to_ptr.vmem [resolvable:$true] %s24_s17 }
  0x22   :  { %p923_p12 = scmp.lt.u32.totalorder %s919_s20, %s1295_s1 }
  0x24   :  { %p925_p13 = pnand %p923_p12, %p920_p11 }
  0x26   :  { %928 = shalt.err (!%p925_p13)
}
  0x27   :  { %s929_s25 = scalar_lea.vmem %s25_s17, 768  ;;  %p934_p1 = scmp.lt.s32.totalorder %s25_s17, %s25_s17 }
  0x28   :  { %p930_p0 = scmp.ne.s32.totalorder %s25_s17, %s929_s25  ;;  %p935_p2 = scmp.lt.s32.totalorder %s929_s25, %s929_s25 }
  0x2a   :  { %p936_p3 = por %p935_p2, %p934_p1 }
  0x2c   :  { %p937_p4 = pnand %p936_p3, %p930_p0 }
  0x2e   :  { %940 = shalt.err (!%p937_p4)
}
  0x2f   :  { %s1022_s2 = smov 64   ;;  %s1023_s26 = smov 4  }
  0x30   :  { %30 = dma.hbm_to_vmem [thread:$0]  %s1295_s1, 768, %s25_s17, [#allocation6], %s1022_s2, %s1022_s2, %s1023_s26  }
  0x31   :  { %s1024_s29 = smov [#allocation10]   ;;  %s941_s8 = scalar_lea.hbm %s1297_s3, 1024 }
  0x32   :  { %s48_s30 = sshll.u32 %s1024_s29, 4  ;;  %p942_p5 = scmp.ne.s32.totalorder %s1297_s3, %s941_s8  ;;  %s49_s30 = int_to_ptr.vmem [resolvable:$true] %s48_s30 }
  0x33   :  { %p945_p6 = scmp.lt.u32.totalorder %s941_s8, %s1297_s3 }
  0x35   :  { %p947_p7 = pnand %p945_p6, %p942_p5 }
  0x37   :  { %950 = shalt.err (!%p947_p7)
}
  0x38   :  { %s951_s14 = scalar_lea.vmem %s49_s30, 1024  ;;  %p956_p9 = scmp.lt.s32.totalorder %s49_s30, %s49_s30 }
  0x39   :  { %p952_p8 = scmp.ne.s32.totalorder %s49_s30, %s951_s14  ;;  %p957_p10 = scmp.lt.s32.totalorder %s951_s14, %s951_s14 }
  0x3b   :  { %p958_p11 = por %p957_p10, %p956_p9 }
  0x3d   :  { %p959_p12 = pnand %p958_p11, %p952_p8 }
  0x3f   :  { %962 = shalt.err (!%p959_p12)
}
  0x40   :  { %54 = dma.hbm_to_vmem [thread:$0]  %s1297_s3, 1024, %s49_s30, [#allocation9], %s1022_s2, %s1022_s2, %s1023_s26  }
  0x41   :  { %1009 = dma.done.wait [#allocation6], 768  }
  0x42   :  { %1010 = vsyncadd [#allocation6], 4294966528 }
  0x43   :  { %1011 = dma.done.wait [#allocation9], 1280  }
  0x44   :  { %1012 = vsyncadd [#allocation9], 4294966016  ;;  %v1025_v0 = vmov 0.0   ;;  %vm1026_vm0 = vmmov 0   ;;  %v1122_v1 = vld [vmem:[#allocation10] sm:$0xff]   ;;  %v1125_v2 = vld [vmem:[#allocation10 + $0x8] sm:$0xff]   ;;  %v89_v18 = vlaneseq }
  0x45   :  { %723 = vmatprep.subr.bf16.mxu0 %v1025_v0  ;;  %739 = vmatprep.mubr.msk.bf16.mxu0 %vm1026_vm0, %v1025_v0  ;;  %v1131_v3 = vld [vmem:[#allocation10 + $0x10] sm:$0xff]   ;;  %v1137_v4 = vld [vmem:[#allocation10 + $0x18] sm:$0xff]   ;;  %v1143_v5 = vld [vmem:[#allocation10 + $0x20] sm:$0xff]   ;;  %s95_s3 = sld [smem:[#allocation4]]  ;;  %s588_s16 = sld [smem:[#allocation4 + $0x1]] }
  0x46   :  { %743 = vmatprep.subr.bf16.mxu1 %v1025_v0  ;;  %759 = vmatprep.mubr.msk.bf16.mxu1 %vm1026_vm0, %v1025_v0  ;;  %v1149_v6 = vld [vmem:[#allocation10 + $0x28] sm:$0xff]   ;;  %v1155_v7 = vld [vmem:[#allocation10 + $0x30] sm:$0xff]   ;;  %v1161_v8 = vld [vmem:[#allocation10 + $0x38] sm:$0xff]   ;;  %v1188_v22 = vshrl.u32 %v89_v18, 7  ;;  %s591_s17 = sld [smem:[#allocation4 + $0x2]]  ;;  %s594_s18 = sld [smem:[#allocation4 + $0x3]] }
  0x47   :  { %724 = vmatpush3.bf16.msra.mxu0 %v1122_v1  ;;  %744 = vmatpush3.bf16.msra.mxu1 %v1122_v1  ;;  %v69_v9 = vld [vmem:[#allocation8] sm:$0xff]  ;;  %v70_v10 = vld [vmem:[#allocation8 + $0x8] sm:$0xff]  ;;  %v616_v12 = vld [vmem:[#allocation5] sm:$0xff]   ;;  %s597_s19 = sld [smem:[#allocation4 + $0x4]]  ;;  %s600_s20 = sld [smem:[#allocation4 + $0x5]] }
  0x48   :  { %725 = vmatprep.subr.bf16.mxu0 %v1025_v0  ;;  %745 = vmatprep.subr.bf16.mxu1 %v1025_v0  ;;  %v96_v11 = vpack.c.bf16 %v70_v10, %v69_v9  ;;  %v617_v13 = vunpack.c.l.bf16 %v616_v12  ;;  %v618_v14 = vunpack.c.h.bf16 %v616_v12  ;;  %v1191_v23 = vadd.s32 8, %v1188_v22  ;;  %v625_v30 = vld [vmem:[#allocation5 + $0x8] sm:$0xff]   ;;  %v634_v45 = vld [vmem:[#allocation5 + $0x10] sm:$0xff]   ;;  %v643_v60 = vld [vmem:[#allocation5 + $0x18] sm:$0xff]   ;;  %s1027_s21 = smov [#allocation12]   ;;  %s1028_s23 = smov [#allocation11]  }
  0x49   :  { %v626_v31 = vunpack.c.l.bf16 %v625_v30  ;;  %v627_v32 = vunpack.c.h.bf16 %v625_v30  ;;  %v635_v46 = vunpack.c.l.bf16 %v634_v45  ;;  %v636_v47 = vunpack.c.h.bf16 %v634_v45  ;;  %s561_s22 = sshll.u32 %s1027_s21, 4  ;;  %s549_s24 = sshll.u32 %s1028_s23, 4  ;;  %s562_s22 = int_to_ptr.vmem [resolvable:$true] %s561_s22  ;;  %s1257_s24 = int_to_ptr.vmem [resolvable:$true] %s549_s24 }
  0x4a   :  { %v644_v61 = vunpack.c.l.bf16 %v643_v60  ;;  %v645_v62 = vunpack.c.h.bf16 %v643_v60  ;;  %s963_s25 = scalar_lea.vmem %s562_s22, 256  ;;  %p968_p0 = scmp.lt.s32.totalorder %s562_s22, %s562_s22 }
  0x4b   :  { %726 = vmatpush3.bf16.msra.mxu0 %v1125_v2  ;;  %746 = vmatpush3.bf16.msra.mxu1 %v1125_v2  ;;  %v192_v24 = vstv %s95_s3  ;;  %v257_v39 = vstv %s588_s16  ;;  %p964_p13 = scmp.ne.s32.totalorder %s562_s22, %s963_s25  ;;  %p969_p1 = scmp.lt.s32.totalorder %s963_s25, %s963_s25 }
  0x4c   :  { %727 = vmatprep.subr.bf16.mxu0 %v1025_v0  ;;  %747 = vmatprep.subr.bf16.mxu1 %v1025_v0  ;;  %vm193_vm1 = vcmp.lt.s32.totalorder %v1188_v22, %v192_v24  ;;  %vm194_vm2 = vcmp.lt.s32.totalorder %v1191_v23, %v192_v24  ;;  %vm258_vm3 = vcmp.lt.s32.totalorder %v1188_v22, %v257_v39  ;;  %v323_v54 = vstv %s591_s17 }
  0x4d   :  { %vm259_vm4 = vcmp.lt.s32.totalorder %v1191_v23, %v257_v39  ;;  %vm324_vm5 = vcmp.lt.s32.totalorder %v1188_v22, %v323_v54  ;;  %vm325_vm6 = vcmp.lt.s32.totalorder %v1191_v23, %v323_v54  ;;  %p970_p2 = por %p969_p1, %p968_p0 }
  0x4f   :  { %728 = vmatpush3.bf16.msra.mxu0 %v1131_v3  ;;  %748 = vmatpush3.bf16.msra.mxu1 %v1131_v3  ;;  %p971_p3 = pnand %p970_p2, %p964_p13 }
  0x50   :  { %729 = vmatprep.subr.bf16.mxu0 %v1025_v0  ;;  %749 = vmatprep.subr.bf16.mxu1 %v1025_v0 }
  0x53   :  { %730 = vmatpush3.bf16.msra.mxu0 %v1137_v4  ;;  %750 = vmatpush3.bf16.msra.mxu1 %v1137_v4 }
  0x54   :  { %731 = vmatprep.subr.bf16.mxu0 %v1025_v0  ;;  %751 = vmatprep.subr.bf16.mxu1 %v1025_v0 }
  0x57   :  { %732 = vmatpush3.bf16.msra.mxu0 %v1143_v5  ;;  %752 = vmatpush3.bf16.msra.mxu1 %v1143_v5 }
  0x58   :  { %733 = vmatprep.subr.bf16.mxu0 %v1025_v0  ;;  %753 = vmatprep.subr.bf16.mxu1 %v1025_v0 }
  0x5b   :  { %734 = vmatpush3.bf16.msra.mxu0 %v1149_v6  ;;  %754 = vmatpush3.bf16.msra.mxu1 %v1149_v6 }
  0x5c   :  { %735 = vmatprep.subr.bf16.mxu0 %v1025_v0  ;;  %755 = vmatprep.subr.bf16.mxu1 %v1025_v0 }
  0x5f   :  { %736 = vmatpush3.bf16.msra.mxu0 %v1155_v7  ;;  %756 = vmatpush3.bf16.msra.mxu1 %v1155_v7 }
  0x60   :  { %737 = vmatprep.subr.bf16.mxu0 %v1025_v0  ;;  %757 = vmatprep.subr.bf16.mxu1 %v1025_v0 }
  0x63   :  { %738 = vmatpush3.bf16.msra.mxu0 %v1161_v8  ;;  %758 = vmatpush3.bf16.msra.mxu1 %v1161_v8 }
  0x64   :  { %763 = vmatprep.subr.bf16.mxu0 %v1025_v0  ;;  %783 = vmatprep.subr.bf16.mxu1 %v1025_v0 }
  0x66   :  { %740 = vmatmul.mubr.bf16.vlgmr.msra.gmra.mrb[0].mxu0 %v96_v11  ;;  %v652_v11 = vld [vmem:[#allocation5 + $0x20] sm:$0xff]  }
  0x67   :  { %764 = vmatpush3.bf16.msra.mxu0 %v1122_v1  ;;  %779 = vmatprep.mubr.msk.bf16.mxu0 %vm1026_vm0, %v1025_v0  ;;  %v653_v12 = vunpack.c.l.bf16 %v652_v11 }
  0x68   :  { %765 = vmatprep.subr.bf16.mxu0 %v1025_v0 }
  0x6b   :  { %766 = vmatpush3.bf16.msra.mxu0 %v1125_v2 }
  0x6c   :  { %767 = vmatprep.subr.bf16.mxu0 %v1025_v0 }
  0x6f   :  { %768 = vmatpush3.bf16.msra.mxu0 %v1131_v3 }
  0x70   :  { %769 = vmatprep.subr.bf16.mxu0 %v1025_v0 }
  0x73   :  { %770 = vmatpush3.bf16.msra.mxu0 %v1137_v4 }
  0x74   :  { %771 = vmatprep.subr.bf16.mxu0 %v1025_v0 }
  0x77   :  { %772 = vmatpush3.bf16.msra.mxu0 %v1143_v5 }
  0x78   :  { %773 = vmatprep.subr.bf16.mxu0 %v1025_v0 }
  0x7b   :  { %774 = vmatpush3.bf16.msra.mxu0 %v1149_v6 }
  0x7c   :  { %775 = vmatprep.subr.bf16.mxu0 %v1025_v0 }
  0x7f   :  { %776 = vmatpush3.bf16.msra.mxu0 %v1155_v7 }
  0x80   :  { %777 = vmatprep.subr.bf16.mxu0 %v1025_v0 }
  0x83   :  { %778 = vmatpush3.bf16.msra.mxu0 %v1161_v8 }
  0x84   :  { %803 = vmatprep.subr.bf16.mxu0 %v1025_v0 }
 0x139   :  { %v183_v15 = vpop.f32.mrb[0].mxu0 }
 0x13a   :  { %v184_v16 = vadd.f32 %v617_v13, %v183_v15  ;;  %v741_v17 = vpop.f32.mrb[1].mxu0  ;;  %v654_v13 = vunpack.c.h.bf16 %v652_v11 }
 0x13b   :  { %v186_v19 = vpop.f32.mrb[2].mxu0 }
 0x13c   :  { %863 = vtanh.f32 %v184_v16  ;;  %v187_v20 = vadd.f32 %v618_v14, %v186_v19  ;;  %v742_v21 = vpop.f32.mrb[3].mxu0 }
 0x13e   :  { %865 = vtanh.f32 %v187_v20  ;;  %v455_v20 = vstv %s597_s19 }
 0x13f   :  { %vm456_vm9 = vcmp.lt.s32.totalorder %v1188_v22, %v455_v20  ;;  %vm457_vm10 = vcmp.lt.s32.totalorder %v1191_v23, %v455_v20 }
 0x146   :  { %v864_v25 = vpop.eup %863 }
 0x147   :  { %v195_v27 = vsel %vm193_vm1, %v864_v25, %v69_v9 }
 0x148   :  { %v866_v26 = vpop.eup %865 }
 0x149   :  { %v196_v28 = vsel %vm194_vm2, %v866_v26, %v70_v10 }
 0x14a   :  { %v197_v29 = vpack.c.bf16 %v196_v28, %v195_v27 }
 0x14c   :  { %623 = vst [vmem:[#allocation11] sm:$0xff] %v197_v29   ;;  %760 = vmatmul.mubr.bf16.vlgmr.msra.gmra.mrb[0].mxu1 %v197_v29 }
 0x14d   :  { %784 = vmatpush3.bf16.msra.mxu1 %v1122_v1  ;;  %799 = vmatprep.mubr.msk.bf16.mxu1 %vm1026_vm0, %v1025_v0 }
 0x14e   :  { %785 = vmatprep.subr.bf16.mxu1 %v1025_v0 }
 0x151   :  { %786 = vmatpush3.bf16.msra.mxu1 %v1125_v2 }
 0x152   :  { %787 = vmatprep.subr.bf16.mxu1 %v1025_v0 }
 0x155   :  { %788 = vmatpush3.bf16.msra.mxu1 %v1131_v3 }
 0x156   :  { %789 = vmatprep.subr.bf16.mxu1 %v1025_v0 }
 0x159   :  { %790 = vmatpush3.bf16.msra.mxu1 %v1137_v4 }
 0x15a   :  { %791 = vmatprep.subr.bf16.mxu1 %v1025_v0 }
 0x15d   :  { %792 = vmatpush3.bf16.msra.mxu1 %v1143_v5 }
 0x15e   :  { %793 = vmatprep.subr.bf16.mxu1 %v1025_v0 }
 0x161   :  { %794 = vmatpush3.bf16.msra.mxu1 %v1149_v6 }
 0x162   :  { %795 = vmatprep.subr.bf16.mxu1 %v1025_v0 }
 0x165   :  { %796 = vmatpush3.bf16.msra.mxu1 %v1155_v7 }
 0x166   :  { %797 = vmatprep.subr.bf16.mxu1 %v1025_v0 }
 0x169   :  { %798 = vmatpush3.bf16.msra.mxu1 %v1161_v8 }
 0x16a   :  { %823 = vmatprep.subr.bf16.mxu1 %v1025_v0 }
 0x21f   :  { %v248_v33 = vpop.f32.mrb[0].mxu1 }
 0x220   :  { %v249_v34 = vadd.f32 %v626_v31, %v248_v33  ;;  %v761_v35 = vpop.f32.mrb[1].mxu1 }
 0x221   :  { %v251_v36 = vpop.f32.mrb[2].mxu1 }
 0x222   :  { %867 = vtanh.f32 %v249_v34  ;;  %v252_v37 = vadd.f32 %v627_v32, %v251_v36  ;;  %v762_v38 = vpop.f32.mrb[3].mxu1 }
 0x224   :  { %869 = vtanh.f32 %v252_v37  ;;  %v521_v37 = vstv %s600_s20 }
 0x225   :  { %vm522_vm11 = vcmp.lt.s32.totalorder %v1188_v22, %v521_v37  ;;  %vm523_vm12 = vcmp.lt.s32.totalorder %v1191_v23, %v521_v37 }
 0x22c   :  { %v868_v40 = vpop.eup %867 }
 0x22d   :  { %v260_v42 = vsel %vm258_vm3, %v868_v40, %v195_v27 }
 0x22e   :  { %v870_v41 = vpop.eup %869 }
 0x22f   :  { %v261_v43 = vsel %vm259_vm4, %v870_v41, %v196_v28  ;;  %v661_v28 = vld [vmem:[#allocation5 + $0x28] sm:$0xff]  }
 0x230   :  { %v262_v44 = vpack.c.bf16 %v261_v43, %v260_v42  ;;  %v662_v29 = vunpack.c.l.bf16 %v661_v28  ;;  %v663_v30 = vunpack.c.h.bf16 %v661_v28 }
 0x232   :  { %632 = vst [vmem:[#allocation11 + $0x8] sm:$0xff] %v262_v44   ;;  %780 = vmatmul.mubr.bf16.vlgmr.msra.gmra.mrb[4].mxu0 %v262_v44 }
 0x233   :  { %804 = vmatpush3.bf16.msra.mxu0 %v1122_v1  ;;  %819 = vmatprep.mubr.msk.bf16.mxu0 %vm1026_vm0, %v1025_v0 }
 0x234   :  { %805 = vmatprep.subr.bf16.mxu0 %v1025_v0 }
 0x237   :  { %806 = vmatpush3.bf16.msra.mxu0 %v1125_v2 }
 0x238   :  { %807 = vmatprep.subr.bf16.mxu0 %v1025_v0 }
 0x23b   :  { %808 = vmatpush3.bf16.msra.mxu0 %v1131_v3 }
 0x23c   :  { %809 = vmatprep.subr.bf16.mxu0 %v1025_v0 }
 0x23f   :  { %810 = vmatpush3.bf16.msra.mxu0 %v1137_v4 }
 0x240   :  { %811 = vmatprep.subr.bf16.mxu0 %v1025_v0 }
 0x243   :  { %812 = vmatpush3.bf16.msra.mxu0 %v1143_v5 }
 0x244   :  { %813 = vmatprep.subr.bf16.mxu0 %v1025_v0 }
 0x247   :  { %814 = vmatpush3.bf16.msra.mxu0 %v1149_v6 }
 0x248   :  { %815 = vmatprep.subr.bf16.mxu0 %v1025_v0 }
 0x24b   :  { %816 = vmatpush3.bf16.msra.mxu0 %v1155_v7 }
 0x24c   :  { %817 = vmatprep.subr.bf16.mxu0 %v1025_v0 }
 0x24f   :  { %818 = vmatpush3.bf16.msra.mxu0 %v1161_v8 }
 0x305   :  { %v314_v48 = vpop.f32.mrb[4].mxu0 }
 0x306   :  { %v315_v49 = vadd.f32 %v635_v46, %v314_v48  ;;  %v781_v50 = vpop.f32.mrb[5].mxu0 }
 0x307   :  { %v317_v51 = vpop.f32.mrb[6].mxu0 }
 0x308   :  { %871 = vtanh.f32 %v315_v49  ;;  %v318_v52 = vadd.f32 %v636_v47, %v317_v51  ;;  %v782_v53 = vpop.f32.mrb[7].mxu0 }
 0x30a   :  { %873 = vtanh.f32 %v318_v52 }
 0x312   :  { %v872_v55 = vpop.eup %871 }
 0x313   :  { %v326_v57 = vsel %vm324_vm5, %v872_v55, %v260_v42 }
 0x314   :  { %v874_v56 = vpop.eup %873 }
 0x315   :  { %v327_v58 = vsel %vm325_vm6, %v874_v56, %v261_v43 }
 0x316   :  { %v328_v59 = vpack.c.bf16 %v327_v58, %v326_v57 }
 0x318   :  { %641 = vst [vmem:[#allocation11 + $0x10] sm:$0xff] %v328_v59   ;;  %800 = vmatmul.mubr.bf16.vlgmr.msra.gmra.mrb[4].mxu1 %v328_v59 }
 0x319   :  { %824 = vmatpush3.bf16.msra.mxu1 %v1122_v1  ;;  %839 = vmatprep.mubr.msk.bf16.mxu1 %vm1026_vm0, %v1025_v0 }
 0x31a   :  { %825 = vmatprep.subr.bf16.mxu1 %v1025_v0 }
 0x31d   :  { %826 = vmatpush3.bf16.msra.mxu1 %v1125_v2 }
 0x31e   :  { %827 = vmatprep.subr.bf16.mxu1 %v1025_v0 }
 0x321   :  { %828 = vmatpush3.bf16.msra.mxu1 %v1131_v3 }
 0x322   :  { %829 = vmatprep.subr.bf16.mxu1 %v1025_v0 }
 0x325   :  { %830 = vmatpush3.bf16.msra.mxu1 %v1137_v4 }
 0x326   :  { %831 = vmatprep.subr.bf16.mxu1 %v1025_v0 }
 0x329   :  { %832 = vmatpush3.bf16.msra.mxu1 %v1143_v5 }
 0x32a   :  { %833 = vmatprep.subr.bf16.mxu1 %v1025_v0 }
 0x32d   :  { %834 = vmatpush3.bf16.msra.mxu1 %v1149_v6  ;;  %v389_v6 = vstv %s594_s18 }
 0x32e   :  { %835 = vmatprep.subr.bf16.mxu1 %v1025_v0  ;;  %vm390_vm7 = vcmp.lt.s32.totalorder %v1188_v22, %v389_v6  ;;  %vm391_vm8 = vcmp.lt.s32.totalorder %v1191_v23, %v389_v6 }
 0x331   :  { %836 = vmatpush3.bf16.msra.mxu1 %v1155_v7 }
 0x332   :  { %837 = vmatprep.subr.bf16.mxu1 %v1025_v0 }
 0x335   :  { %838 = vmatpush3.bf16.msra.mxu1 %v1161_v8 }
 0x3eb   :  { %v380_v63 = vpop.f32.mrb[4].mxu1 }
 0x3ec   :  { %v381_v1 = vadd.f32 %v644_v61, %v380_v63  ;;  %v801_v2 = vpop.f32.mrb[5].mxu1 }
 0x3ed   :  { %v383_v3 = vpop.f32.mrb[6].mxu1 }
 0x3ee   :  { %875 = vtanh.f32 %v381_v1  ;;  %v384_v4 = vadd.f32 %v645_v62, %v383_v3  ;;  %v802_v5 = vpop.f32.mrb[7].mxu1 }
 0x3f0   :  { %877 = vtanh.f32 %v384_v4 }
 0x3f8   :  { %v876_v9 = vpop.eup %875 }
 0x3f9   :  { %v392_v7 = vsel %vm390_vm7, %v876_v9, %v326_v57 }
 0x3fa   :  { %v878_v0 = vpop.eup %877 }
 0x3fb   :  { %v393_v8 = vsel %vm391_vm8, %v878_v0, %v327_v58 }
 0x3fc   :  { %v394_v10 = vpack.c.bf16 %v393_v8, %v392_v7 }
 0x3fe   :  { %650 = vst [vmem:[#allocation11 + $0x18] sm:$0xff] %v394_v10   ;;  %820 = vmatmul.mubr.bf16.vlgmr.msra.gmra.mrb[8].mxu0 %v394_v10 }
 0x4d1   :  { %v446_v14 = vpop.f32.mrb[8].mxu0 }
 0x4d2   :  { %v447_v15 = vadd.f32 %v653_v12, %v446_v14  ;;  %v821_v16 = vpop.f32.mrb[9].mxu0 }
 0x4d3   :  { %v449_v17 = vpop.f32.mrb[10].mxu0 }
 0x4d4   :  { %879 = vtanh.f32 %v447_v15  ;;  %v450_v18 = vadd.f32 %v654_v13, %v449_v17  ;;  %v822_v19 = vpop.f32.mrb[11].mxu0 }
 0x4d6   :  { %881 = vtanh.f32 %v450_v18 }
 0x4de   :  { %v880_v21 = vpop.eup %879 }
 0x4df   :  { %v458_v25 = vsel %vm456_vm9, %v880_v21, %v392_v7 }
 0x4e0   :  { %v882_v24 = vpop.eup %881 }
 0x4e1   :  { %v459_v26 = vsel %vm457_vm10, %v882_v24, %v393_v8 }
 0x4e2   :  { %v460_v27 = vpack.c.bf16 %v459_v26, %v458_v25 }
 0x4e4   :  { %659 = vst [vmem:[#allocation11 + $0x20] sm:$0xff] %v460_v27   ;;  %840 = vmatmul.mubr.bf16.vlgmr.msra.gmra.mrb[8].mxu1 %v460_v27 }
 0x5b7   :  { %v512_v31 = vpop.f32.mrb[8].mxu1 }
 0x5b8   :  { %v513_v32 = vadd.f32 %v662_v29, %v512_v31  ;;  %v841_v33 = vpop.f32.mrb[9].mxu1 }
 0x5b9   :  { %v515_v34 = vpop.f32.mrb[10].mxu1 }
 0x5ba   :  { %883 = vtanh.f32 %v513_v32  ;;  %v516_v35 = vadd.f32 %v663_v30, %v515_v34  ;;  %v842_v36 = vpop.f32.mrb[11].mxu1 }
 0x5bc   :  { %885 = vtanh.f32 %v516_v35 }
 0x5c4   :  { %v884_v38 = vpop.eup %883 }
 0x5c5   :  { %v524_v39 = vsel %vm522_vm11, %v884_v38, %v458_v25 }
 0x5c6   :  { %v886_v40 = vpop.eup %885  ;;  %542 = vst [vmem:[#allocation12] sm:$0xff] %v524_v39 }
 0x5c7   :  { %v525_v41 = vsel %vm523_vm12, %v886_v40, %v459_v26 }
 0x5c8   :  { %v667_v42 = vpack.c.bf16 %v525_v41, %v524_v39  ;;  %543 = vst [vmem:[#allocation12 + $0x8] sm:$0xff] %v525_v41 }
 0x5c9   :  { %974 = shalt.err (!%p971_p3)
}
 0x5ca   :  { %s975_s29 = scalar_lea.hbm %s1299_s5, 256 }
 0x5cb   :  { %p976_p4 = scmp.ne.s32.totalorder %s1299_s5, %s975_s29  ;;  %p979_p5 = scmp.lt.u32.totalorder %s975_s29, %s1299_s5 }
 0x5cd   :  { %p981_p6 = pnand %p979_p5, %p976_p4 }
 0x5cf   :  { %984 = shalt.err (!%p981_p6)
}
 0x5d0   :  { %567 = dma.vmem_to_hbm [thread:$0]  %s562_s22, 256, %s1299_s5, [#allocation13], %s1019_s12, %s1019_s12, %s1020_s13   ;;  %668 = vst [vmem:[#allocation11 + $0x28] sm:$0xff] %v667_v42  }
 0x5d1   :  { %s985_s0 = scalar_lea.vmem %s1257_s24, 768  ;;  %p990_p8 = scmp.lt.s32.totalorder %s1257_s24, %s1257_s24 }
 0x5d2   :  { %p986_p7 = scmp.ne.s32.totalorder %s1257_s24, %s985_s0  ;;  %p991_p9 = scmp.lt.s32.totalorder %s985_s0, %s985_s0 }
 0x5d4   :  { %p992_p10 = por %p991_p9, %p990_p8 }
 0x5d6   :  { %p993_p11 = pnand %p992_p10, %p986_p7 }
 0x5d8   :  { %996 = shalt.err (!%p993_p11)
}
 0x5d9   :  { %s997_s1 = scalar_lea.hbm %s1298_s4, 768 }
 0x5da   :  { %p998_p12 = scmp.ne.s32.totalorder %s1298_s4, %s997_s1  ;;  %p1001_p13 = scmp.lt.u32.totalorder %s997_s1, %s1298_s4 }
 0x5dc   :  { %p1003_p0 = pnand %p1001_p13, %p998_p12 }
 0x5de   :  { %1006 = shalt.err (!%p1003_p0)
}
 0x5df   :  { %555 = dma.vmem_to_hbm [thread:$0]  %s1257_s24, 768, %s1298_s4, [#allocation7], %s1022_s2, %s1022_s2, %s1023_s26  }
 0x5e0   :  { %1013 = dma.done.wait [#allocation7], 768  }
 0x5e1   :  { %1014 = vsyncadd [#allocation7], 4294966528 }
 0x5e2   :  { %1015 = dma.done.wait [#allocation13], 256  }
 0x5e3   :  { %1016 = vsyncadd [#allocation13], 4294967040 }
 0x5e4   :  { %574 = vsyncpa [#allocation6], 1 }
 0x5e5   :  { %575 = vsyncpa [#allocation9], 1 }
 0x5e6   :  { %576 = vsyncpa [#allocation7], 1 }
 0x5e7   :  { %577 = vsyncpa [#allocation13], 1 }

</bundles_post_ra>
